<compile_context>
chip_gen: v7x
topology: tpu7x:2x2x1
jax: 0.10.0
libtpu: 0.0.40
codegen_flags: <defaults>
</compile_context>

<pallas_src>
import functools

import jax
import jax.numpy as jnp
from jax.experimental import pallas as pl
from jax.experimental.pallas import tpu as pltpu


def _round_up(x, m):
    return (x + m - 1) // m * m


def _combine_logsoftmax(res, dh, dtot):
    """res: (B, Dpad) = [hidden | output | zero-pad].

    Returns the same tile with log_softmax applied to columns [dh, dtot) and the
    pad columns zeroed; hidden columns [0, dh) are left untouched.  All masking is
    done on full 128-lane tiles so no lane-crossing slices are generated in-kernel.
    """
    col = jax.lax.broadcasted_iota(jnp.int32, res.shape, 1)
    y_mask = (col >= dh) & (col < dtot)
    z = jnp.where(y_mask, res, -jnp.inf)
    z_max = jnp.max(z, axis=1, keepdims=True)
    p = jnp.exp(z - z_max)                       # 0 on masked columns
    lse = jnp.log(jnp.sum(p, axis=1, keepdims=True))
    logsm = res - z_max - lse
    return jnp.where(col < dh, res, jnp.where(y_mask, logsm, 0.0))


# ---------------------------------------------------------------------------
# Single-step kernel (faithful to RNN.forward)
# ---------------------------------------------------------------------------
def rnn_cell_kernel(x_ref, h_ref, wx_ref, wh_ref, b_ref, out_ref, *, dh, dtot):
    # cat((X, H), 1) @ W  ==  X @ W[:Din] + H @ W[Din:]  (split matmul, no concat),
    # and the hidden/output Linear layers are column-fused into one matmul pair.
    res = (jnp.dot(x_ref[...], wx_ref[...], preferred_element_type=jnp.float32)
           + jnp.dot(h_ref[...], wh_ref[...], preferred_element_type=jnp.float32)
           + b_ref[...])
    out_ref[...] = _combine_logsoftmax(res, dh, dtot).astype(out_ref.dtype)


# ---------------------------------------------------------------------------
# Fused-sequence kernel: grid over time, weights VMEM-resident, hidden carried
# in VMEM scratch.
# ---------------------------------------------------------------------------
def rnn_seq_kernel(x_ref, h0_ref, wx_ref, wh_ref, b_ref, out_ref, h_carry, *, dh, dtot):
    t = pl.program_id(0)

    @pl.when(t == 0)
    def _():
        h_carry[...] = h0_ref[...].astype(jnp.float32)

    # wh_ref is (Dpad, Dpad) with rows >= dh zeroed, so the non-hidden columns of the
    # carried (Bpad, Dpad) tile contribute nothing -> no lane slicing of the carry.
    res = (jnp.dot(x_ref[...], wx_ref[...], preferred_element_type=jnp.float32)
           + jnp.dot(h_carry[...], wh_ref[...], preferred_element_type=jnp.float32)
           + b_ref[...])
    out = _combine_logsoftmax(res, dh, dtot)
    h_carry[...] = out                       # columns < dh are the raw new hidden
    out_ref[...] = out.astype(out_ref.dtype)


# ---------------------------------------------------------------------------
# Wrappers
# ---------------------------------------------------------------------------
def _prep_fused_weights(W_hidden, b_hidden, W_output, b_output, Din, Dh, Dout, Dpad):
    Dtot = Dh + Dout
    W_cat = jnp.concatenate([W_hidden, W_output], axis=1)        # (Din+Dh, Dtot)
    W_cat = jnp.pad(W_cat, ((0, 0), (0, Dpad - Dtot)))           # lane-dense width
    Wx = W_cat[:Din]                                             # (Din, Dpad)
    Wh = W_cat[Din:]                                             # (Dh,  Dpad)
    b = jnp.pad(jnp.concatenate([b_hidden, b_output]), (0, Dpad - Dtot)).reshape(1, Dpad)
    return Wx, Wh, b


def rnn_forward(X, H, W_hidden, b_hidden, W_output, b_output):
    """Single cell step.  X: (B, Din), H: (B, Dh).
    W_hidden: (Din+Dh, Dh), b_hidden: (Dh,), W_output: (Din+Dh, Dout), b_output: (Dout,)
    Returns (log_softmax(output), new_hidden) — same math as the PyTorch forward."""
    B, Din = X.shape
    Dh = H.shape[1]
    Dout = W_output.shape[1]
    Dtot = Dh + Dout
    Dpad = _round_up(max(Dtot, 128), 128)      # lane-dense output width
    Bpad = _round_up(max(B, 8), 8)             # sublane-aligned batch

    Wx, Wh, b = _prep_fused_weights(W_hidden, b_hidden, W_output, b_output,
                                    Din, Dh, Dout, Dpad)
    Xp = jnp.pad(X, ((0, Bpad - B), (0, 0)))
    Hp = jnp.pad(H, ((0, Bpad - B), (0, 0)))

    vmem = pl.BlockSpec(memory_space=pltpu.MemorySpace.VMEM)
    kernel = functools.partial(rnn_cell_kernel, dh=Dh, dtot=Dtot)
    slab = pl.pallas_call(
        kernel,
        out_shape=jax.ShapeDtypeStruct((Bpad, Dpad), X.dtype),
        in_specs=[vmem] * 5,
        out_specs=vmem,
    )(Xp, Hp, Wx, Wh, b)

    h_new = slab[:B, :Dh]
    y = slab[:B, Dh:Dtot]
    return y, h_new


def rnn_forward_sequence(Xs, H0, W_hidden, b_hidden, W_output, b_output):
    """Applies the RNN cell over a sequence in ONE pallas_call.
    Xs: (T, B, Din), H0: (B, Dh).  Returns (Ys: (T, B, Dout), H_final: (B, Dh))."""
    T, B, Din = Xs.shape
    Dh = H0.shape[1]
    Dout = W_output.shape[1]
    Dtot = Dh + Dout
    Dpad = _round_up(max(Dtot, 128), 128)
    Bpad = _round_up(max(B, 8), 8)

    Wx, Wh, b = _prep_fused_weights(W_hidden, b_hidden, W_output, b_output,
                                    Din, Dh, Dout, Dpad)
    # Pad Wh rows to Dpad with zeros so the carried hidden tile can stay full-width.
    Wh_pad = jnp.pad(Wh, ((0, Dpad - Dh), (0, 0)))               # (Dpad, Dpad)
    Xp = jnp.pad(Xs, ((0, 0), (0, Bpad - B), (0, 0)))            # (T, Bpad, Din)
    H0p = jnp.pad(H0, ((0, Bpad - B), (0, Dpad - Dh)))           # (Bpad, Dpad)

    kernel = functools.partial(rnn_seq_kernel, dh=Dh, dtot=Dtot)
    grid_spec = pltpu.PrefetchScalarGridSpec(
        num_scalar_prefetch=0,
        grid=(T,),
        in_specs=[
            pl.BlockSpec((None, Bpad, Din), lambda t: (t, 0, 0)),   # X[t], auto-pipelined
            pl.BlockSpec((Bpad, Dpad), lambda t: (0, 0)),           # H0 (resident)
            pl.BlockSpec((Din, Dpad), lambda t: (0, 0)),            # Wx (resident)
            pl.BlockSpec((Dpad, Dpad), lambda t: (0, 0)),           # Wh (resident)
            pl.BlockSpec((1, Dpad), lambda t: (0, 0)),              # bias (resident)
        ],
        out_specs=pl.BlockSpec((None, Bpad, Dpad), lambda t: (t, 0, 0)),
        scratch_shapes=[pltpu.VMEM((Bpad, Dpad), jnp.float32)],     # hidden carry
    )
    slab = pl.pallas_call(
        kernel,
        out_shape=jax.ShapeDtypeStruct((T, Bpad, Dpad), Xs.dtype),
        grid_spec=grid_spec,
        compiler_params=pltpu.CompilerParams(dimension_semantics=("arbitrary",)),
    )(Xp, H0p, Wx, Wh_pad, b)

    Ys = slab[:, :B, Dh:Dtot]
    H_final = slab[T - 1, :B, :Dh]
    return Ys, H_final


if __name__ == "__main__":
    input_size, hidden_size, output_size, batch, seq_len = 16, 32, 8, 4, 6

    key = jax.random.PRNGKey(0)
    k = jax.random.split(key, 7)

    W_hidden = jax.random.normal(k[0], (input_size + hidden_size, hidden_size), jnp.float32) * 0.1
    b_hidden = jax.random.normal(k[1], (hidden_size,), jnp.float32) * 0.1
    W_output = jax.random.normal(k[2], (input_size + hidden_size, output_size), jnp.float32) * 0.1
    b_output = jax.random.normal(k[3], (output_size,), jnp.float32) * 0.1

    X = jax.random.normal(k[4], (batch, input_size), jnp.float32)
    H = jax.random.normal(k[5], (batch, hidden_size), jnp.float32)
    Xs = jax.random.normal(k[6], (seq_len, batch, input_size), jnp.float32)

    # --- single step (module-faithful forward) ---
    y, h_new = rnn_forward(X, H, W_hidden, b_hidden, W_output, b_output)
    jax.block_until_ready((y, h_new))

    def ref_cell(x, h):
        cat = jnp.concatenate([x, h], axis=1)
        h_ref = cat @ W_hidden + b_hidden
        y_ref = jax.nn.log_softmax(cat @ W_output + b_output, axis=1)
        return y_ref, h_ref

    y_ref, h_ref = ref_cell(X, H)
    assert jnp.allclose(y, y_ref, atol=1e-4), "single-step output mismatch"
    assert jnp.allclose(h_new, h_ref, atol=1e-4), "single-step hidden mismatch"

    # --- fused sequence (same cell applied T times in one pallas_call) ---
    Ys, H_fin = rnn_forward_sequence(Xs, H, W_hidden, b_hidden, W_output, b_output)
    jax.block_until_ready((Ys, H_fin))

    def scan_body(h, x):
        yy, hh = ref_cell(x, h)
        return hh, yy

    H_fin_ref, Ys_ref = jax.lax.scan(scan_body, H, Xs)
    assert jnp.allclose(Ys, Ys_ref, rtol=1e-4, atol=5e-4), "sequence output mismatch"
    assert jnp.allclose(H_fin, H_fin_ref, rtol=1e-4, atol=5e-4), "sequence hidden mismatch"

    print("KERNEL_OK")
</pallas_src>

<mosaic_0001>
module attributes {stable_mosaic.version = 11 : i64} {
  func.func @rnn_cell_kernel(%arg0: memref<8x16xf32, #tpu.memory_space<vmem>>, %arg1: memref<8x32xf32, #tpu.memory_space<vmem>>, %arg2: memref<16x128xf32, #tpu.memory_space<vmem>>, %arg3: memref<32x128xf32, #tpu.memory_space<vmem>>, %arg4: memref<1x128xf32, #tpu.memory_space<vmem>>, %arg5: memref<8x128xf32, #tpu.memory_space<vmem>>) attributes {dimension_semantics = [], scalar_prefetch = 0 : i64, scratch_operands = 0 : i64, tpu.core_type = #tpu.core_type<tc>} {
    %c0 = arith.constant 0 : index
    %c0_0 = arith.constant 0 : index
    %0 = vector.load %arg0[%c0, %c0_0] : memref<8x16xf32, #tpu.memory_space<vmem>>, vector<8x16xf32>
    %c0_1 = arith.constant 0 : index
    %c0_2 = arith.constant 0 : index
    %1 = vector.load %arg2[%c0_1, %c0_2] : memref<16x128xf32, #tpu.memory_space<vmem>>, vector<16x128xf32>
    %cst = arith.constant dense<0.000000e+00> : vector<8x128xf32>
    %2 = tpu.matmul %0, %1, %cst {dimension_numbers = #tpu.dot_dimension_numbers<[1], [0], [0], [1], [0, 0, 1, 1], [], []>} : vector<8x16xf32>, vector<16x128xf32>, vector<8x128xf32> -> vector<8x128xf32>
    %c0_3 = arith.constant 0 : index
    %c0_4 = arith.constant 0 : index
    %3 = vector.load %arg1[%c0_3, %c0_4] : memref<8x32xf32, #tpu.memory_space<vmem>>, vector<8x32xf32>
    %c0_5 = arith.constant 0 : index
    %c0_6 = arith.constant 0 : index
    %4 = vector.load %arg3[%c0_5, %c0_6] : memref<32x128xf32, #tpu.memory_space<vmem>>, vector<32x128xf32>
    %cst_7 = arith.constant dense<0.000000e+00> : vector<8x128xf32>
    %5 = tpu.matmul %3, %4, %cst_7 {dimension_numbers = #tpu.dot_dimension_numbers<[1], [0], [0], [1], [0, 0, 1, 1], [], []>} : vector<8x32xf32>, vector<32x128xf32>, vector<8x128xf32> -> vector<8x128xf32>
    %6 = arith.addf %2, %5 : vector<8x128xf32>
    %c0_8 = arith.constant 0 : index
    %c0_9 = arith.constant 0 : index
    %7 = vector.load %arg4[%c0_8, %c0_9] : memref<1x128xf32, #tpu.memory_space<vmem>>, vector<1x128xf32>
    %8 = vector.broadcast %7 : vector<1x128xf32> to vector<8x128xf32>
    %9 = arith.addf %6, %8 : vector<8x128xf32>
    %10 = tpu.iota {dimensions = array<i32: 1>} : vector<8x128xi32>
    %c32_i32 = arith.constant 32 : i32
    %11 = vector.broadcast %c32_i32 : i32 to vector<8x128xi32>
    %12 = arith.cmpi sge, %10, %11 : vector<8x128xi32>
    %c40_i32 = arith.constant 40 : i32
    %13 = vector.broadcast %c40_i32 : i32 to vector<8x128xi32>
    %14 = arith.cmpi slt, %10, %13 : vector<8x128xi32>
    %15 = arith.andi %12, %14 : vector<8x128xi1>
    %cst_10 = arith.constant 0xFF800000 : f32
    %16 = vector.broadcast %cst_10 : f32 to vector<8x128xf32>
    %17 = arith.select %15, %9, %16 : vector<8x128xi1>, vector<8x128xf32>
    %cst_11 = arith.constant dense<0xFF800000> : vector<8xf32>
    %18 = vector.multi_reduction <maximumf>, %17, %cst_11 [1] : vector<8x128xf32> to vector<8xf32>
    %19 = vector.shape_cast %18 : vector<8xf32> to vector<8x1xf32>
    %20 = vector.broadcast %19 : vector<8x1xf32> to vector<8x128xf32>
    %21 = arith.subf %17, %20 : vector<8x128xf32>
    %22 = math.exp %21 : vector<8x128xf32>
    %cst_12 = arith.constant dense<0.000000e+00> : vector<8xf32>
    %23 = vector.multi_reduction <add>, %22, %cst_12 [1] : vector<8x128xf32> to vector<8xf32>
    %24 = vector.shape_cast %23 : vector<8xf32> to vector<8x1xf32>
    %25 = math.log %24 : vector<8x1xf32>
    %26 = vector.broadcast %19 : vector<8x1xf32> to vector<8x128xf32>
    %27 = arith.subf %9, %26 : vector<8x128xf32>
    %28 = vector.broadcast %25 : vector<8x1xf32> to vector<8x128xf32>
    %29 = arith.subf %27, %28 : vector<8x128xf32>
    %c32_i32_13 = arith.constant 32 : i32
    %30 = vector.broadcast %c32_i32_13 : i32 to vector<8x128xi32>
    %31 = arith.cmpi slt, %10, %30 : vector<8x128xi32>
    %cst_14 = arith.constant 0.000000e+00 : f32
    %32 = vector.broadcast %cst_14 : f32 to vector<8x128xf32>
    %33 = arith.select %15, %29, %32 : vector<8x128xi1>, vector<8x128xf32>
    %34 = arith.select %31, %9, %33 : vector<8x128xi1>, vector<8x128xf32>
    %c0_15 = arith.constant 0 : index
    %c0_16 = arith.constant 0 : index
    %35 = vector.load %arg5[%c0_15, %c0_16] : memref<8x128xf32, #tpu.memory_space<vmem>>, vector<8x128xf32>
    tpu.vector_store %arg5[%c0_15, %c0_16], %34 {strides = array<i32>} : memref<8x128xf32, #tpu.memory_space<vmem>>, vector<8x128xf32>,
    return
  }
}

</mosaic_0001>

<bundles_post_ra>
// kernel: tpu_custom_call.1
= control target key start
LH: loop header
LB: loop body
LE: loop exit
PB: predicated region body
PF: predicated region fallthrough
CT: control target
= control target key end

     0   :  { %10 = vsyncpa [#allocation3], 0  ;;  %s555_s0 = inlined_call_operand.hbm [shape: f32[8,16], index: 0, kind: input, shape index: {}]   ;;  %s556_s1 = inlined_call_operand.hbm [shape: f32[8,32], index: 1, kind: input, shape index: {}]   ;;  %s557_s2 = inlined_call_operand.hbm [shape: f32[16,128], index: 2, kind: input, shape index: {}]   ;;  %s558_s3 = inlined_call_operand.hbm [shape: f32[32,128], index: 3, kind: input, shape index: {}]   ;;  %s559_s4 = inlined_call_operand.vmem [shape: f32[1,128], index: 4, kind: input, shape index: {}]   ;;  %s560_s5 = inlined_call_operand.hbm [shape: f32[8,128], index: 5, kind: output, shape index: {}]  }
   0x1   :  { %11 = vsyncpa [#allocation6], 0 }
   0x2   :  { %12 = vsyncpa [#allocation9], 0 }
   0x3   :  { %13 = vsyncpa [#allocation4], 0  ;;  %s444_s18 = smov [#allocation5]   ;;  %s445_s20 = smov [#allocation2]  }
   0x4   :  { %s30_s19 = sshll.u32 %s444_s18, 4  ;;  %s20_s21 = sshll.u32 %s445_s20, 4  ;;  %s31_s19 = int_to_ptr.vmem [resolvable:$true] %s30_s19  ;;  %s21_s21 = int_to_ptr.vmem [resolvable:$true] %s20_s21 }
   0x5   :  { %s326_s24 = scalar_lea.hbm %s556_s1, 128 }
   0x6   :  { %p327_p0 = scmp.ne.s32.totalorder %s556_s1, %s326_s24  ;;  %p330_p1 = scmp.lt.u32.totalorder %s326_s24, %s556_s1 }
   0x8   :  { %p332_p2 = pnand %p330_p1, %p327_p0 }
   0xa   :  { %335 = shalt.err (!%p332_p2)
}
   0xb   :  { %s336_s29 = scalar_lea.vmem %s31_s19, 128  ;;  %p341_p4 = scmp.lt.s32.totalorder %s31_s19, %s31_s19 }
   0xc   :  { %p337_p3 = scmp.ne.s32.totalorder %s31_s19, %s336_s29  ;;  %p342_p5 = scmp.lt.s32.totalorder %s336_s29, %s336_s29 }
   0xe   :  { %p343_p6 = por %p342_p5, %p341_p4 }
  0x10   :  { %p344_p7 = pnand %p343_p6, %p337_p3 }
  0x12   :  { %347 = shalt.err (!%p344_p7)
}
  0x13   :  { %33 = dma.hbm_to_vmem [thread:$0]  %s556_s1, 128, %s31_s19, [#allocation6]  }
  0x14   :  { %s348_s9 = scalar_lea.hbm %s555_s0, 128 }
  0x15   :  { %p349_p8 = scmp.ne.s32.totalorder %s555_s0, %s348_s9  ;;  %p352_p9 = scmp.lt.u32.totalorder %s348_s9, %s555_s0 }
  0x17   :  { %p354_p10 = pnand %p352_p9, %p349_p8 }
  0x19   :  { %357 = shalt.err (!%p354_p10)
}
  0x1a   :  { %s358_s14 = scalar_lea.vmem %s21_s21, 128  ;;  %p363_p12 = scmp.lt.s32.totalorder %s21_s21, %s21_s21 }
  0x1b   :  { %p359_p11 = scmp.ne.s32.totalorder %s21_s21, %s358_s14  ;;  %p364_p13 = scmp.lt.s32.totalorder %s358_s14, %s358_s14 }
  0x1d   :  { %p365_p0 = por %p364_p13, %p363_p12 }
  0x1f   :  { %p366_p1 = pnand %p365_p0, %p359_p11 }
  0x21   :  { %369 = shalt.err (!%p366_p1)
}
  0x22   :  { %23 = dma.hbm_to_vmem [thread:$0]  %s555_s0, 128, %s21_s21, [#allocation3]  }
  0x23   :  { %s446_s16 = smov [#allocation7]   ;;  %s370_s20 = scalar_lea.hbm %s557_s2, 256 }
  0x24   :  { %s39_s17 = sshll.u32 %s446_s16, 4  ;;  %p371_p2 = scmp.ne.s32.totalorder %s557_s2, %s370_s20  ;;  %s40_s17 = int_to_ptr.vmem [resolvable:$true] %s39_s17 }
  0x25   :  { %p374_p3 = scmp.lt.u32.totalorder %s370_s20, %s557_s2 }
  0x27   :  { %p376_p4 = pnand %p374_p3, %p371_p2 }
  0x29   :  { %379 = shalt.err (!%p376_p4)
}
  0x2a   :  { %s380_s26 = scalar_lea.vmem %s40_s17, 256  ;;  %p385_p6 = scmp.lt.s32.totalorder %s40_s17, %s40_s17 }
  0x2b   :  { %p381_p5 = scmp.ne.s32.totalorder %s40_s17, %s380_s26  ;;  %p386_p7 = scmp.lt.s32.totalorder %s380_s26, %s380_s26 }
  0x2d   :  { %p387_p8 = por %p386_p7, %p385_p6 }
  0x2f   :  { %p388_p9 = pnand %p387_p8, %p381_p5 }
  0x31   :  { %391 = shalt.err (!%p388_p9)
}
  0x32   :  { %s447_s0 = smov 128   ;;  %s448_s21 = smov 8  }
  0x33   :  { %45 = dma.hbm_to_vmem [thread:$0]  %s557_s2, 256, %s40_s17, [#allocation6], %s447_s0, %s447_s0, %s448_s21  }
  0x34   :  { %s449_s29 = smov [#allocation8]   ;;  %s392_s8 = scalar_lea.hbm %s558_s3, 512 }
  0x35   :  { %s51_s30 = sshll.u32 %s449_s29, 4  ;;  %p393_p10 = scmp.ne.s32.totalorder %s558_s3, %s392_s8  ;;  %s52_s30 = int_to_ptr.vmem [resolvable:$true] %s51_s30 }
  0x36   :  { %p396_p11 = scmp.lt.u32.totalorder %s392_s8, %s558_s3 }
  0x38   :  { %p398_p12 = pnand %p396_p11, %p393_p10 }
  0x3a   :  { %401 = shalt.err (!%p398_p12)
}
  0x3b   :  { %s402_s13 = scalar_lea.vmem %s52_s30, 512  ;;  %p407_p0 = scmp.lt.s32.totalorder %s52_s30, %s52_s30 }
  0x3c   :  { %p403_p13 = scmp.ne.s32.totalorder %s52_s30, %s402_s13  ;;  %p408_p1 = scmp.lt.s32.totalorder %s402_s13, %s402_s13 }
  0x3e   :  { %p409_p2 = por %p408_p1, %p407_p0 }
  0x40   :  { %p410_p3 = pnand %p409_p2, %p403_p13 }
  0x42   :  { %413 = shalt.err (!%p410_p3)
}
  0x43   :  { %57 = dma.hbm_to_vmem [thread:$0]  %s558_s3, 512, %s52_s30, [#allocation9], %s447_s0, %s447_s0, %s448_s21  }
  0x44   :  { %436 = dma.done.wait [#allocation3], 128  }
  0x45   :  { %437 = vsyncadd [#allocation3], 4294967168 }
  0x46   :  { %438 = dma.done.wait [#allocation6], 384  }
  0x47   :  { %439 = vsyncadd [#allocation6], 4294966912 }
  0x48   :  { %440 = dma.done.wait [#allocation9], 512  }
  0x49   :  { %441 = vsyncadd [#allocation9], 4294966784  ;;  %v450_v0 = vmov 0.0|0.0   ;;  %vm451_vm0 = vmmov 0   ;;  %v452_v1 = vmov 0.0   ;;  %v76_v2 = vld [vmem:[#allocation8] sm:$0xff]  ;;  %v236_v13 = vlaneseq }
  0x4a   :  { %303 = vmatprep.subr.bf16.mxu0 %v450_v0  ;;  %309 = vmatprep.subr.bf16.mxu1 %v450_v0  ;;  %v77_v3 = vld [vmem:[#allocation8 + $0x8] sm:$0xff]  ;;  %v73_v4 = vld [vmem:[#allocation7] sm:$0xff]  ;;  %v74_v6 = vld [vmem:[#allocation7 + $0x8] sm:$0xff]  ;;  %vm154_vm1 = vcmask 130048   ;;  %vm80_vm2 = vcmask 261120  }
  0x4b   :  { %300 = vmatprep.mubr.msk.f32.mxu1 %vm451_vm0, %v452_v1  ;;  %293 = vmatprep.mubr.msk.f32.mxu0 %vm451_vm0, %v452_v1  ;;  %v304_v5 = vpack.c.bf16 %v77_v3, %v76_v2  ;;  %v78_v7 = vld [vmem:[#allocation8 + $0x10] sm:$0xff]  ;;  %v79_v8 = vld [vmem:[#allocation8 + $0x18] sm:$0xff]  ;;  %v310_v9 = vpack.c.bf16 %v74_v6, %v73_v4  ;;  %v72_v11 = vld [vmem:[#allocation2] sm:$0xff]  ;;  %v237_v14 = vand.u32 127, %v236_v13 }
  0x4c   :  { %v307_v10 = vpack.c.bf16 %v79_v8, %v78_v7  ;;  %v75_v12 = vld [vmem:[#allocation5] sm:$0xff]  ;;  %v276_v18 = vld [vmem:[%s559_s4] ss:$0 sm:$0xff]  ;;  %s453_s4 = smov [#allocation10]  }
  0x4d   :  { %305 = vmatpush3.bf16.msra.mxu0 %v304_v5  ;;  %311 = vmatpush3.bf16.msra.mxu1 %v310_v9  ;;  %vm238_vm3 = vcmp.ge.s32.totalorder %v237_v14, 32  ;;  %vm239_vm4 = vcmp.lt.s32.totalorder %v237_v14, 40  ;;  %s263_s15 = sshll.u32 %s453_s4, 4  ;;  %vm253_vm6 = vcmp.lt.s32.totalorder %v237_v14, 32  ;;  %s264_s15 = int_to_ptr.vmem [resolvable:$true] %s263_s15 }
  0x4e   :  { %306 = vmatprep.subr.bf16.mxu0 %v450_v0  ;;  %vm535_vm5 = vmand %vm238_vm3, %vm239_vm4  ;;  %s414_s16 = scalar_lea.vmem %s264_s15, 128  ;;  %p419_p5 = scmp.lt.s32.totalorder %s264_s15, %s264_s15 }
  0x4f   :  { %p415_p4 = scmp.ne.s32.totalorder %s264_s15, %s414_s16  ;;  %p420_p6 = scmp.lt.s32.totalorder %s414_s16, %s414_s16 }
  0x50   :  { %301 = vmatmul.mubr.msk.f32.vlgmr.msra.gmra.mrb[0].mxu1 %vm154_vm1, %v72_v11 }
  0x51   :  { %308 = vmatpush3.bf16.msra.mxu0 %v307_v10  ;;  %p421_p7 = por %p420_p6, %p419_p5 }
  0x53   :  { %p422_p8 = pnand %p421_p7, %p415_p4 }
  0x54   :  { %294 = vmatmul.mubr.msk.f32.vlgmr.msra.gmra.mrb[0].mxu0 %vm80_vm2, %v75_v12 }
 0x123   :  { %v224_v15 = vpop.f32.mrb[0].mxu1 }
 0x124   :  { %v302_v16 = vpop.f32.mrb[1].mxu1 }
 0x127   :  { %v150_v17 = vpop.f32.mrb[0].mxu0 }
 0x128   :  { %v225_v19 = vadd.f32 %v224_v15, %v150_v17  ;;  %v295_v20 = vpop.f32.mrb[1].mxu0 }
 0x12a   :  { %v235_v22 = vadd.f32 %v276_v18, %v225_v19 }
 0x12c   :  { %v241_v23 = vsel %vm535_vm5, %v235_v22, -inf }
 0x12d   :  { %242 = vmax.xlane.f32.xlu0 %v241_v23 }
 0x1ba   :  { %v243_v24 = vpop.xlane.xlu0 %242 }
 0x1bb   :  { %v244_v25 = vsub.f32 %v241_v23, %v243_v24  ;;  %v251_v30 = vsub.f32 %v235_v22, %v243_v24 }
 0x1bd   :  { %v245_v26 = vmul.f32 1.442695, %v244_v25 }
 0x1bf   :  { %322 = vpow2.f32 %v245_v26 }
 0x1c9   :  { %v323_v27 = vpop.eup %322 }
 0x1ca   :  { %247 = vadd.xlane.f32.xlu0 %v323_v27 }
 0x257   :  { %v248_v28 = vpop.xlane.xlu0 %247 }
 0x258   :  { %324 = vlog2.f32 %v248_v28 }
 0x262   :  { %v325_v29 = vpop.eup %324 }
 0x263   :  { %v250_v31 = vmul.f32 0.6931472, %v325_v29 }
 0x265   :  { %v252_v32 = vsub.f32 %v251_v30, %v250_v31 }
 0x267   :  { %v254_v33 = vsel %vm535_vm5, %v252_v32, 0.0 }
 0x268   :  { %v255_v34 = vsel %vm253_vm6, %v235_v22, %v254_v33 }
 0x269   :  { %256 = vst [vmem:[#allocation10] sm:$0xff] %v255_v34 }
 0x26a   :  { %425 = shalt.err (!%p422_p8)
}
 0x26b   :  { %s426_s19 = scalar_lea.hbm %s560_s5, 128 }
 0x26c   :  { %p427_p9 = scmp.ne.s32.totalorder %s560_s5, %s426_s19  ;;  %p430_p10 = scmp.lt.u32.totalorder %s426_s19, %s560_s5 }
 0x26e   :  { %p432_p11 = pnand %p430_p10, %p427_p9 }
 0x270   :  { %435 = shalt.err (!%p432_p11)
}
 0x271   :  { %266 = dma.vmem_to_hbm [thread:$0]  %s264_s15, 128, %s560_s5, [#allocation4]  }
 0x272   :  { %442 = dma.done.wait [#allocation4], 128  }
 0x273   :  { %443 = vsyncadd [#allocation4], 4294967168 }
 0x274   :  { %270 = vsyncpa [#allocation3], 1 }
 0x275   :  { %271 = vsyncpa [#allocation6], 1 }
 0x276   :  { %272 = vsyncpa [#allocation9], 1 }
 0x277   :  { %273 = vsyncpa [#allocation4], 1 }

</bundles_post_ra>
